<compile_context>
chip_gen: v5e
topology: v5e:2x2
jax: 0.10.0
libtpu: 0.0.40
codegen_flags: <defaults>
</compile_context>

<pallas_src>
import jax
import jax.numpy as jnp
from jax.experimental import pallas as pl
from jax.experimental.pallas import tpu as pltpu


# ----------------------------- kernel bodies ------------------------------ #

def _outconv_kernel_2d(x_ref, w_ref, b_ref, o_ref):
    # x_ref: (Cin, T)   w_ref: (Cout, Cin)   b_ref: (Cout, 1)   o_ref: (Cout, T)
    acc = jnp.dot(w_ref[...], x_ref[...], preferred_element_type=jnp.float32)
    o_ref[...] = (acc + b_ref[...]).astype(o_ref.dtype)


def _outconv_kernel_batched(x_ref, w_ref, b_ref, o_ref):
    # x_ref: (TN, Cin, T)   w_ref: (Cout, Cin)   b_ref: (Cout, 1)
    # o_ref: (TN, Cout, T)
    # Static unrolled loop over the (small) batch block: each image is the
    # same lane-dense (Cout, T) = (Cout, Cin) @ (Cin, T) matmul as the 2-D
    # path; batching only enlarges the per-step DMA slab.
    w = w_ref[...]
    b = b_ref[...]
    for i in range(x_ref.shape[0]):
        acc = jnp.dot(w, x_ref[i], preferred_element_type=jnp.float32)
        o_ref[i] = (acc + b).astype(o_ref.dtype)


# ----------------------------- sizing helpers ------------------------------ #

def _round_up(x, m):
    return ((x + m - 1) // m) * m


def _vmem_budget_and_limit():
    """(tile budget for double-buffered in+out blocks, vmem_limit_bytes),
    sized per TPU generation.  v7x has 64 MiB VMEM/TC; v5e/v6e have 128 MiB."""
    vmem_cap = None
    try:
        vmem_cap = getattr(pltpu.get_tpu_info(), "vmem_capacity_bytes", None)
    except Exception:
        vmem_cap = None
    if vmem_cap is None:
        try:
            kind = jax.devices()[0].device_kind.lower()
            vmem_cap = (64 << 20) if "v7" in kind else (128 << 20)
        except Exception:
            vmem_cap = 64 << 20  # conservative fallback
    if vmem_cap <= (64 << 20):
        # v7x: leave headroom for resident weight/bias, Mosaic scratch, sems.
        return 20 << 20, 40 << 20
    # v5e / v6e: larger tiles -> fewer ~600-cycle grid steps, bigger DMAs.
    return 56 << 20, 96 << 20


def _choose_tile_hw(hw, per_lane_bytes, budget_bytes):
    """Largest lane tile (multiple of 128, or the full HW extent) whose
    double-buffered blocks fit `budget_bytes`, preferring a tile that divides
    HW evenly (tail-free, fully lane-dense output stores)."""
    max_lanes = max(128, budget_bytes // max(per_lane_bytes, 1))
    if hw <= max_lanes:
        return hw                                  # full extent (any HW)
    cap = max(128, (min(hw, max_lanes) // 128) * 128)
    t = cap
    while t >= 128:                                # prefer an exact divisor
        if hw % t == 0:
            return t
        t -= 128
    return cap                                     # ragged tail (write-masked)


# --------------------------------- wrapper --------------------------------- #

def outconv_pallas(x_nchw, weight, bias):
    """1x1 Conv2d forward (PyTorch OutConv).

    x_nchw: (N, Cin, H, W)
    weight: (Cout, Cin, 1, 1)   -- PyTorch Conv2d weight layout
    bias:   (Cout,)
    returns (N, Cout, H, W)
    """
    N, Cin, H, W = x_nchw.shape
    Cout = weight.shape[0]
    HW = H * W

    # Free reshapes only -- no transpose / pad / slice copies.
    x3 = x_nchw.reshape(N, Cin, HW)          # (N, Cin, HW)
    w_mat = weight.reshape(Cout, Cin)        # (Cout, Cin)
    b_mat = bias.reshape(Cout, 1)            # (Cout, 1), broadcasts over lanes

    dtype = x_nchw.dtype
    itemsize = jnp.dtype(dtype).itemsize
    pack = max(8, 32 // itemsize)            # sublane packing: 8 f32, 16 bf16, 32 i8
    cin_pad = _round_up(Cin, pack)
    cout_pad = _round_up(Cout, pack)

    tile_budget, vmem_limit = _vmem_budget_and_limit()

    # Real per-lane footprint of one image's double-buffered in+out blocks
    # (sublane-padded), plus the f32 accumulator temp for sub-32-bit dtypes.
    per_lane_img = 2 * (cin_pad + cout_pad) * itemsize
    if itemsize < 4:
        per_lane_img += _round_up(Cout, 8) * 4

    tile_hw = _choose_tile_hw(HW, per_lane_img, tile_budget)

    # Batch blocking: when one lane tile already covers all of HW, process TN
    # images per grid step to amortize per-step overhead / enlarge DMAs.
    tn = 1
    if tile_hw == HW and N > 1:
        max_tn = max(1, tile_budget // max(per_lane_img * HW, 1))
        tn = min(8, N, max_tn)
        while tn > 1 and pl.cdiv(N, tn) < 2:     # keep >=2 cells for v7x megacore
            tn -= 1
        while tn > 1 and N % tn != 0:            # avoid a ragged batch block
            tn -= 1

    num_hw = pl.cdiv(HW, tile_hw)
    # Guarantee >=2 grid cells (both v7x TensorCores busy) for N=1 inference.
    if N == 1 and num_hw == 1 and HW >= 256:
        tile_hw = max(128, (pl.cdiv(HW, 2) // 128) * 128)
        num_hw = pl.cdiv(HW, tile_hw)

    grid = (pl.cdiv(N, tn), num_hw)

    if tn == 1:
        kernel = _outconv_kernel_2d
        x_spec = pl.BlockSpec((None, Cin, tile_hw), lambda n, j: (n, 0, j))
        o_spec = pl.BlockSpec((None, Cout, tile_hw), lambda n, j: (n, 0, j))
    else:
        kernel = _outconv_kernel_batched
        x_spec = pl.BlockSpec((tn, Cin, tile_hw), lambda n, j: (n, 0, j))
        o_spec = pl.BlockSpec((tn, Cout, tile_hw), lambda n, j: (n, 0, j))

    cost = pl.CostEstimate(
        flops=2 * N * HW * Cin * Cout,
        transcendentals=0,
        bytes_accessed=N * HW * (Cin + Cout) * itemsize
        + (Cin * Cout + Cout) * itemsize,
    )

    out = pl.pallas_call(
        kernel,
        out_shape=jax.ShapeDtypeStruct((N, Cout, HW), dtype),
        grid_spec=pltpu.PrefetchScalarGridSpec(
            num_scalar_prefetch=0,
            grid=grid,
            in_specs=[
                x_spec,
                # Weight / bias: constant index maps -> DMA'd once, resident.
                pl.BlockSpec((Cout, Cin), lambda n, j: (0, 0)),
                pl.BlockSpec((Cout, 1), lambda n, j: (0, 0)),
            ],
            out_specs=o_spec,
        ),
        compiler_params=pltpu.CompilerParams(
            dimension_semantics=("parallel", "parallel"),
            vmem_limit_bytes=vmem_limit,
        ),
        cost_estimate=cost,
    )(x3, w_mat, b_mat)

    return out.reshape(N, Cout, H, W)


# ----------------------------------- test ---------------------------------- #

if __name__ == "__main__":
    key = jax.random.PRNGKey(0)
    k_x, k_w, k_b = jax.random.split(key, 3)

    N, Cin, Cout, Hs, Ws = 2, 4, 2, 16, 16

    x = jax.random.normal(k_x, (N, Cin, Hs, Ws), dtype=jnp.float32)
    # Deterministic init matching Conv2d(in=4, out=2, kernel_size=1) shapes.
    weight = jax.random.normal(k_w, (Cout, Cin, 1, 1), dtype=jnp.float32) * 0.1
    bias = jax.random.normal(k_b, (Cout,), dtype=jnp.float32) * 0.1

    w_mat = weight.reshape(Cout, Cin)

    # Path 1: per-image (squeezed batch) blocks.
    y = outconv_pallas(x, weight, bias)
    jax.block_until_ready(y)
    y_ref = jnp.einsum("nchw,oc->nohw", x, w_mat) + bias[None, :, None, None]
    assert y.shape == (N, Cout, Hs, Ws)
    assert jnp.allclose(y, y_ref, atol=1e-5, rtol=1e-5)

    # Path 2: batched small-feature-map blocks (TN images per grid step).
    N2 = 4
    x2 = jax.random.normal(jax.random.PRNGKey(1), (N2, Cin, Hs, Ws), dtype=jnp.float32)
    y2 = outconv_pallas(x2, weight, bias)
    jax.block_until_ready(y2)
    y2_ref = jnp.einsum("nchw,oc->nohw", x2, w_mat) + bias[None, :, None, None]
    assert y2.shape == (N2, Cout, Hs, Ws)
    assert jnp.allclose(y2, y2_ref, atol=1e-5, rtol=1e-5)

    print("KERNEL_OK")
</pallas_src>

<mosaic_0001>
module attributes {stable_mosaic.version = 11 : i64} {
  func.func @_outconv_kernel_2d(%arg0: i32, %arg1: i32, %arg2: memref<1x4x256xf32, #tpu.memory_space<vmem>>, %arg3: memref<2x4xf32, #tpu.memory_space<vmem>>, %arg4: memref<2x1xf32, #tpu.memory_space<vmem>>, %arg5: memref<1x2x256xf32, #tpu.memory_space<vmem>>) attributes {dimension_semantics = [#tpu.dimension_semantics<parallel>, #tpu.dimension_semantics<parallel>], iteration_bounds = array<i64: 2, 1>, scalar_prefetch = 0 : i64, scratch_operands = 0 : i64, tpu.core_type = #tpu.core_type<tc>, window_params = [{transform_indices = @transform_0, window_bounds = array<i64: 1, 4, 256>}, {pipeline_mode = #tpu.pipeline_mode<synchronous>, transform_indices = @transform_1, window_bounds = array<i64: 2, 4>}, {pipeline_mode = #tpu.pipeline_mode<synchronous>, transform_indices = @transform_2, window_bounds = array<i64: 2, 1>}, {transform_indices = @transform_3, window_bounds = array<i64: 1, 2, 256>}]} {
    %c0 = arith.constant 0 : index
    %c0_0 = arith.constant 0 : index
    %0 = vector.load %arg3[%c0, %c0_0] : memref<2x4xf32, #tpu.memory_space<vmem>>, vector<2x4xf32>
    %c0_1 = arith.constant 0 : index
    %c0_2 = arith.constant 0 : index
    %c0_3 = arith.constant 0 : index
    %1 = vector.load %arg2[%c0_1, %c0_2, %c0_3] : memref<1x4x256xf32, #tpu.memory_space<vmem>>, vector<1x4x256xf32>
    %2 = vector.shape_cast %1 : vector<1x4x256xf32> to vector<4x256xf32>
    %cst = arith.constant dense<0.000000e+00> : vector<2x256xf32>
    %3 = tpu.matmul %0, %2, %cst {dimension_numbers = #tpu.dot_dimension_numbers<[1], [0], [0], [1], [0, 0, 1, 1], [], []>} : vector<2x4xf32>, vector<4x256xf32>, vector<2x256xf32> -> vector<2x256xf32>
    %c0_4 = arith.constant 0 : index
    %c0_5 = arith.constant 0 : index
    %4 = vector.load %arg4[%c0_4, %c0_5] : memref<2x1xf32, #tpu.memory_space<vmem>>, vector<2x1xf32>
    %5 = vector.broadcast %4 : vector<2x1xf32> to vector<2x256xf32>
    %6 = arith.addf %3, %5 : vector<2x256xf32>
    %c0_6 = arith.constant 0 : index
    %c0_7 = arith.constant 0 : index
    %c0_8 = arith.constant 0 : index
    %7 = vector.load %arg5[%c0_6, %c0_7, %c0_8] : memref<1x2x256xf32, #tpu.memory_space<vmem>>, vector<1x2x256xf32>
    %8 = vector.shape_cast %7 : vector<1x2x256xf32> to vector<2x256xf32>
    %9 = vector.shape_cast %6 : vector<2x256xf32> to vector<1x2x256xf32>
    tpu.vector_store %arg5[%c0_6, %c0_7, %c0_8], %9 {strides = array<i32>} : memref<1x2x256xf32, #tpu.memory_space<vmem>>, vector<1x2x256xf32>,
    return
  }
  func.func @transform_0(%arg0: i32, %arg1: i32) -> (i32, i32, i32) {
    %c0_i32 = arith.constant 0 : i32
    %c0_i32_0 = arith.constant 0 : i32
    return %arg0, %c0_i32, %arg1 : i32, i32, i32
  }
  func.func @transform_1(%arg0: i32, %arg1: i32) -> (i32, i32) {
    %c0_i32 = arith.constant 0 : i32
    %c0_i32_0 = arith.constant 0 : i32
    %c0_i32_1 = arith.constant 0 : i32
    return %c0_i32, %c0_i32_0 : i32, i32
  }
  func.func @transform_2(%arg0: i32, %arg1: i32) -> (i32, i32) {
    %c0_i32 = arith.constant 0 : i32
    %c0_i32_0 = arith.constant 0 : i32
    %c0_i32_1 = arith.constant 0 : i32
    return %c0_i32, %c0_i32_0 : i32, i32
  }
  func.func @transform_3(%arg0: i32, %arg1: i32) -> (i32, i32, i32) {
    %c0_i32 = arith.constant 0 : i32
    %c0_i32_0 = arith.constant 0 : i32
    return %arg0, %c0_i32, %arg1 : i32, i32, i32
  }
}

</mosaic_0001>

<bundles_post_ra>
// kernel: tpu_custom_call.1
= control target key start
LH: loop header
LB: loop body
LE: loop exit
PB: predicated region body
PF: predicated region fallthrough
CT: control target
= control target key end

     0   :  { %8 = vsyncpa [#allocation3], 0  ;;  %s727_s0 = inlined_call_operand.hbm [shape: f32[2,4,256], index: 0, kind: input, shape index: {}]   ;;  %s728_s1 = inlined_call_operand.vmem [shape: f32[2,4], index: 1, kind: input, shape index: {}]   ;;  %s729_s2 = inlined_call_operand.vmem [shape: f32[2,1], index: 2, kind: input, shape index: {}]   ;;  %s730_s3 = inlined_call_operand.hbm [shape: f32[2,2,256], index: 3, kind: output, shape index: {}]  }
   0x1   :  { %10 = vsyncpa [#allocation3 + $0x1], 0 }
   0x2   :  { %11 = vsyncpa [#allocation4], 0 }
   0x3   :  { %13 = vsyncpa [#allocation4 + $0x1], 0  ;;  %s600_s12 = smov 0   ;;  %s602_s13 = smov 0  }
   0x4   :  { %s604_s14 = smov 0   ;;  %s606_s15 = smov 0  }
   0x5   :  { %s608_s16 = smov 0   ;;  %s610_s17 = smov 0  }
   0x6 LB: > { %s380_s18 = sadd.s32 4294967295, %s577_s17   ;;  %s381_s19 = sadd.s32 4294967294, %s577_s17   ;;  %s577_s17 = sphi %s610_s17, %s19_s17   ;;  %s573_s16 = sphi %s608_s16, %s739_s16   ;;  %s569_s15 = sphi %s606_s15, %s738_s15   ;;  %s565_s14 = sphi %s604_s14, %s737_s14   ;;  %s561_s13 = sphi %s602_s13, %s736_s13   ;;  %s557_s12 = sphi %s600_s12, %s735_s12  }
   0x7   : > { %s31_s20 = sadd.s32 1, %s573_s16  ;;  %s40_s21 = sadd.s32 1, %s565_s14 }
   0x8   : > { %p33_p0 = scmp.ge.s32.totalorder %s31_s20, 2  ;;  %p47_p1 = scmp.ne.s32.totalorder %s565_s14, %s561_s13 }
   0x9   : > { %p48_p2 = scmp.eq.s32.totalorder %s577_s17, 0  ;;  %p53_p3 = scmp.ne.s32.totalorder %s561_s13, %s557_s12 }
   0xa   : > { %s741_s20 = smov (%p33_p0, %s31_s20), 0  ;;  %p54_p5 = scmp.eq.s32.totalorder %s380_s18, 0 }
   0xb   : > { %p641_p4 = por %p48_p2, %p47_p1  ;;  %s35_s23 = ssub.s32 %s573_s16, %s741_s20 }
   0xc   : > { %p121_p6 = scmp.eq.s32.totalorder %s380_s18, 1  ;;  %p38_p7 = scmp.eq.s32.totalorder %s35_s23, 0 }
   0xd   : > { %p647_p8 = por %p54_p5, %p53_p3  ;;  %p127_p10 = scmp.eq.s32.totalorder %s381_s19, 1 }
   0xe   : > { %p651_p9 = por %p121_p6, %p47_p1  ;;  %p383_p12 = scmp.ge.s32.totalorder %s577_s17, 2 }
   0xf   : > { %s656_s26 = scalar_select %p38_p7, %s565_s14, %s40_s21  }
  0x10   : > { %p658_p11 = por %p127_p10, %p53_p3  ;;  %p413_p13 = scmp.lt.s32.totalorder %s577_s17, 2 }
  0x11   : > { %s153_s28 = sand.u32 1, %s565_s14   ;;  %s399_s30 = sshll.u32 %s573_s16, 3 }
  0x12   : > { %s384_s29 = sshll.u32 %s153_s28, 3  ;;  %s164_s6 = scalar_lea.hbm %s727_s0, %s399_s30 }
  0x13   : > { %s157_s7 = scalar_lea.vmem [#allocation2], %s384_s29  ;;  %s166_s9 = sshll.u32 %s164_s6, 4  ;;  %s167_s9 = int_to_ptr.hbm [resolvable:$true] %s166_s9 }
  0x14   : > { %s168_s8 = sshll.u32 %s157_s7, 4  ;;  %p406_p0 = pnand %p413_p13, %p641_p4  ;;  %s169_s8 = int_to_ptr.vmem [resolvable:$true] %s168_s8 }
  0x15   : > { %p387_p1 = scmp.ge.s32.totalorder %s577_s17, 1  ;;  %p173_p2 = scmp.lt.s32.totalorder %s577_s17, 3 }
  0x16   : > { %s154_s10 = scalar_lea.sflag [#allocation3], %s153_s28 }
  0x17   : > { %408 = dma.hbm_to_vmem [thread:$0]  (!%p406_p0), %s167_s9, 128, %s169_s8, %s154_s10  }
  0x18   : > { %p174_p3 = pnand %p387_p1, %p173_p2 }
  0x19   : > { %s674_s11 = sand.u32 (!%p174_p3), 1, %s561_s13  }
  0x1a   : > { %177 = sbr.rel (%p174_p3) target bundleno = 176 (0xb0), region = 32  ;;  %s388_s18 = sshll.u32 (!%p174_p3), %s674_s11, 3 }
  0x1b   : > { %s180_s19 = scalar_lea.sflag (!%p174_p3), [#allocation3], %s674_s11  ;;  %s183_s21 = scalar_lea.vmem (!%p174_p3), [#allocation2], %s388_s18 }
  0x1f   : > { %548 = dma.done.wait (%p647_p8), %s180_s19, 128  }
  0x20   : > { %550 = vsyncadd (%p647_p8), %s180_s19, 4294967168  ;;  %v579_v0 = vmov 0   ;;  %v210_v1 = vld [vmem:[%s183_s21] sm:$0xff]  ;;  %v211_v2 = vld [vmem:[%s729_s2] sm:$0x3]  ;;  %vm225_vm0 = vcmask 1043456  }
  0x21   : > { %464 = vset.pattern.permute.xlu0 %v579_v0  ;;  %218 = vst [vmem:[#allocation1] ss:$2 sm:$0xff] %v210_v1  ;;  %v209_v3 = vld [vmem:[%s728_s1] sm:$0x3]  ;;  %vm221_vm1 = vcmask 31744   ;;  %s389_s24 = sshll.u32 %s674_s11, 2 }
  0x22   : > { %214 = vperm.xlu0 %464, %v211_v2   ;;  %s400_s30 = sshll.u32 %s569_s15, 2  ;;  %s206_s7 = scalar_lea.vmem [#allocation5], %s389_s24  ;;  %vm273_vm2 = vcmask 1041408  }
  0x23   : > { %s291_s6 = scalar_lea.hbm %s730_s3, %s400_s30  ;;  %s293_s8 = sshll.u32 %s206_s7, 4  ;;  %s294_s8 = int_to_ptr.vmem [resolvable:$true] %s293_s8 }
  0x24   : > { %s295_s9 = sshll.u32 %s291_s6, 4  ;;  %s278_s15 = scalar_lea.sflag [#allocation4], %s674_s11  ;;  %s296_s9 = int_to_ptr.hbm [resolvable:$true] %s295_s9 }
  0x25   : > { %s509_s10 = sshra.s32 %s296_s9, 4  ;;  %s515_s22 = scalar_lea.hbm %s730_s3, 8  ;;  %s510_s10 = int_to_ptr.hbm [resolvable:$true] %s509_s10 }
  0x26   : > { %s511_s18 = scalar_lea.hbm %s510_s10, 4  ;;  %p516_p7 = scmp.lt.s32.totalorder %s510_s10, %s730_s3 }
  0x27   : > { %p512_p4 = scmp.ne.s32.totalorder %s510_s10, %s511_s18  ;;  %p517_p8 = scmp.lt.s32.totalorder %s515_s22, %s511_s18 }
  0x28   : > { %v219_v4 = vld.sshfl [vmem:[#allocation1] sm:$0xff pattern:$0x75316420]  ;;  %v220_v5 = vld.sshfl [vmem:[#allocation1 + $0x8] sm:$0xff pattern:$0x75316420] }
  0x29   : > { %390 = vmatpush.msk.msra.mxu0 %vm225_vm0, %v219_v4  ;;  %392 = vmatpush.msk.msra.mxu1 %vm225_vm0, %v220_v5  ;;  %p513_p5 = pnand %p512_p4, %p651_p9  ;;  %p518_p10 = por %p517_p8, %p516_p7 }
  0x2a   : > { %391 = vmatmul.msk.f32.vlgmr.msra.gmra.mxu0 %vm221_vm1, %v209_v3  ;;  %393 = vmatmul.msk.f32.vlgmr.msra.gmra.mxu1 %vm221_vm1, %v209_v3 }
  0x2b   : > { %p514_p6 = pneg %p513_p5 }
  0x2d   : > { %p519_p13 = pnand %p518_p10, %p514_p6 }
  0x94   : > { %v215_v6 = vpop.permute.xlu0 %214 }
  0xa7   : > { %v247_v7 = vpop.f32.mrf.mxu0  ;;  %v267_v8 = vpop.f32.mrf.mxu1 }
  0xa8   : > { %v268_v9 = vadd.f32 %v267_v8, %v215_v6  ;;  %v248_v10 = vadd.f32 %v247_v7, %v215_v6 }
  0xaa   : > { %v272_v11 = vrot.slane %v268_v9, 6 }
  0xac   : > { %v274_v12 = vsel %vm273_vm2, %v248_v10, %v272_v11 }
  0xad   : > { %276 = vst [vmem:[%s206_s7] sm:$0xf] %v274_v12 }
  0xae   : > { %522 = shalt.err (!%p519_p13)
}
  0xaf   : > { %403 = dma.vmem_to_hbm [thread:$0]  (%p651_p9), %s294_s8, 64, %s296_s9, %s278_s15  }
  0xb0 PF: > { %s307_s11 = sand.u32 1, %s557_s12   ;;  %p410_p0 = pnand %p383_p12, %p658_p11 }
  0xb1   : > { %s308_s29 = scalar_lea.sflag [#allocation4], %s307_s11 }
  0xb2   : > { %p411_p1 = pneg %p410_p0 }
  0xb4   : > { %552 = dma.done.wait (%p411_p1), %s308_s29, 64  }
  0xb5   : > { %554 = vsyncadd (%p411_p1), %s308_s29, 4294967232  ;;  %s19_s17 = sadd.s32 1, %s577_s17   ;;  %s735_s12 = smov %s561_s13 }
  0xb6   : > { %p16_p2 = scmp.ge.s32.totalorder %s19_s17, 4   ;;  %s736_s13 = smov %s565_s14 }
  0xb7   : > { %s737_s14 = smov %s656_s26  ;;  %s738_s15 = smov %s573_s16 }
  0xb8   : > { %s739_s16 = smov %s741_s20  ;;  %18 = sbr.rel (!%p16_p2) target bundleno = 6 (0x6), region = 77 }
  0xbd   :  { %314 = vsyncpa [#allocation3], 1 }
  0xbe   :  { %316 = vsyncpa [#allocation3 + $0x1], 1 }
  0xbf   :  { %317 = vsyncpa [#allocation4], 1 }
  0xc0   :  { %319 = vsyncpa [#allocation4 + $0x1], 1 }

</bundles_post_ra>
